<compile_context>
chip_gen: v7x
topology: tpu7x:2x2x1
jax: 0.10.0
libtpu: 0.0.40
codegen_flags: <defaults>
</compile_context>

<pallas_src>
import functools
import math

import jax
import jax.numpy as jnp
from jax.experimental import pallas as pl
from jax.experimental.pallas import tpu as pltpu


def _round_up(x, m):
    return ((x + m - 1) // m) * m


def _per_channel_kernel(x_ref, t_ref, ce_ref, dc_ref,
                        bce_acc, inter_acc, sig_acc, tgt_acc, *, inv_v):
    k = pl.program_id(2)

    @pl.when(k == 0)
    def _():
        bce_acc[...] = jnp.zeros_like(bce_acc)
        inter_acc[...] = jnp.zeros_like(inter_acc)
        sig_acc[...] = jnp.zeros_like(sig_acc)
        tgt_acc[...] = jnp.zeros_like(tgt_acc)

    x = x_ref[0, 0].astype(jnp.float32)          # (T, 128) logits
    t = t_ref[0, 0].astype(jnp.float32)          # (T, 128) binary labels

    # Shared exp(-|x|): drives both the BCE log term and the sigmoid.
    e = jnp.exp(-jnp.abs(x))
    softplus = jnp.log1p(e)                      # log(1 + exp(-|x|))
    bce = jnp.maximum(x, 0.0) - x * t + softplus
    inv = 1.0 / (1.0 + e)
    sig = jnp.where(x >= 0.0, inv, e * inv)      # sigmoid(x), overflow-free

    def fold(v):                                 # (T,128) -> (8,128) via VALU adds
        return jnp.sum(v.reshape(-1, 8, 128), axis=0)

    bce_acc[...] += fold(bce)
    inter_acc[...] += fold(sig * t)
    sig_acc[...] += fold(sig)
    tgt_acc[...] += fold(t)

    @pl.when(k == pl.num_programs(2) - 1)
    def _():
        # Single cross-lane collapse per (sample, channel).
        ce_ref[0, 0] = jnp.sum(bce_acc[...], keepdims=True) * inv_v
        inter = jnp.sum(inter_acc[...], keepdims=True)
        union = (jnp.sum(sig_acc[...], keepdims=True)
                 + jnp.sum(tgt_acc[...], keepdims=True))
        dc_ref[0, 0] = 1.0 - (2.0 * inter + 1.0) / (union + 1.0)


def dice_and_ce_loss(inputs, targets, loc_label, *, weight_ce=2.0,
                     weight_dice=1.0, smooth=1.0, max_tile_rows=2048):
    N, C = targets.shape[0], targets.shape[1]
    V = int(math.prod(targets.shape[2:]))

    # Keep logits in their native dtype (pass bf16 to halve HBM traffic);
    # segmentation labels are exactly {0,1}, so bf16 transport is lossless.
    x = inputs.reshape(N, C, V)
    t = targets.reshape(N, C, V).astype(jnp.bfloat16)

    # Lane-dense layout (N, C, S_pad, 128) with the S axis tiled for the grid.
    S = -(-V // 128)
    S8 = _round_up(max(S, 1), 8)
    num_k = -(-S8 // max_tile_rows)
    T = _round_up(-(-S8 // num_k), 8)
    S_pad = num_k * T
    Vp = S_pad * 128
    if Vp != V:
        # Pad logits very negative / labels zero: padded tail contributes ~0 to
        # both BCE and dice sums, so no per-element validity mask is needed.
        x = jnp.pad(x, ((0, 0), (0, 0), (0, Vp - V)), constant_values=-100.0)
        t = jnp.pad(t, ((0, 0), (0, 0), (0, Vp - V)), constant_values=0)
    x = x.reshape(N, C, S_pad, 128)
    t = t.reshape(N, C, S_pad, 128)

    kernel = functools.partial(_per_channel_kernel, inv_v=1.0 / float(V))

    ce, dc = pl.pallas_call(
        kernel,
        out_shape=(jax.ShapeDtypeStruct((N, C - 1, 1, 1), jnp.float32),
                   jax.ShapeDtypeStruct((N, C - 1, 1, 1), jnp.float32)),
        grid_spec=pltpu.PrefetchScalarGridSpec(
            num_scalar_prefetch=0,
            grid=(N, C - 1, num_k),
            in_specs=[
                pl.BlockSpec((1, 1, T, 128), lambda i, jm, k: (i, jm + 1, k, 0)),
                pl.BlockSpec((1, 1, T, 128), lambda i, jm, k: (i, jm + 1, k, 0)),
            ],
            out_specs=[
                pl.BlockSpec((1, 1, 1, 1), lambda i, jm, k: (i, jm, 0, 0)),
                pl.BlockSpec((1, 1, 1, 1), lambda i, jm, k: (i, jm, 0, 0)),
            ],
            scratch_shapes=[pltpu.VMEM((8, 128), jnp.float32)] * 4,
        ),
        compiler_params=pltpu.CompilerParams(
            dimension_semantics=("parallel", "parallel", "arbitrary")),
    )(x, t)

    ce = ce[:, :, 0, 0]
    dc = dc[:, :, 0, 0]

    # torch.any(loc_label[i, j]) gating + final weighted combine (tiny) in XLA.
    active = jnp.any(loc_label[:, 1:, :] != 0, axis=-1).astype(jnp.float32)
    k_cnt = jnp.sum(active)
    return (weight_ce * jnp.sum(ce * active)
            + weight_dice * jnp.sum(dc * active)) / (k_cnt + smooth)


def reference(inputs, targets, loc_label, weight_ce=2.0, weight_dice=1.0,
              smooth=1.0):
    N, C = targets.shape[0], targets.shape[1]
    ce_all, dc_all, k = 0.0, 0.0, 0.0
    for i in range(N):
        for j in range(1, C):
            if bool(jnp.any(loc_label[i, j] != 0)):
                x = inputs[i, j].reshape(-1).astype(jnp.float32)
                t = targets[i, j].reshape(-1).astype(jnp.float32)
                bce = jnp.mean(jnp.maximum(x, 0.0) - x * t
                               + jnp.log1p(jnp.exp(-jnp.abs(x))))
                s = 1.0 / (1.0 + jnp.exp(-x))
                inter = jnp.sum(s * t)
                union = jnp.sum(s) + jnp.sum(t)
                dc = 1.0 - (2.0 * inter + 1.0) / (union + 1.0)
                ce_all += bce
                dc_all += dc
                k += 1.0
    return (weight_ce * ce_all + weight_dice * dc_all) / (k + smooth)


if __name__ == "__main__":
    key = jax.random.PRNGKey(0)
    k1, k2, k3 = jax.random.split(key, 3)

    N, C, D, H, W, L = 2, 4, 4, 16, 16, 8
    inputs = jax.random.normal(k1, (N, C, D, H, W), dtype=jnp.float32)
    targets = (jax.random.uniform(k2, (N, C, D, H, W)) > 0.5).astype(jnp.float32)
    loc_label = (jax.random.uniform(k3, (N, C, L)) > 0.7).astype(jnp.int32)
    # make one foreground (sample, channel) pair fully inactive to exercise gating
    loc_label = loc_label.at[1, 2, :].set(0)

    out = dice_and_ce_loss(inputs, targets, loc_label,
                           weight_ce=2.0, weight_dice=1.0, smooth=1.0)
    out = jax.block_until_ready(out)

    ref = reference(inputs, targets, loc_label)
    assert abs(float(out) - float(ref)) < 1e-4, (float(out), float(ref))
    print("KERNEL_OK")
</pallas_src>

<mosaic_0001>
module attributes {stable_mosaic.version = 11 : i64} {
  func.func @_per_channel_kernel(%arg0: i32, %arg1: i32, %arg2: i32, %arg3: memref<1x1x8x128xf32, #tpu.memory_space<vmem>>, %arg4: memref<1x1x8x128xbf16, #tpu.memory_space<vmem>>, %arg5: memref<1x1x1x1xf32, #tpu.memory_space<vmem>>, %arg6: memref<1x1x1x1xf32, #tpu.memory_space<vmem>>, %arg7: memref<8x128xf32, #tpu.memory_space<vmem>>, %arg8: memref<8x128xf32, #tpu.memory_space<vmem>>, %arg9: memref<8x128xf32, #tpu.memory_space<vmem>>, %arg10: memref<8x128xf32, #tpu.memory_space<vmem>>) attributes {dimension_semantics = [#tpu.dimension_semantics<parallel>, #tpu.dimension_semantics<parallel>, #tpu.dimension_semantics<arbitrary>], iteration_bounds = array<i64: 2, 3, 1>, scalar_prefetch = 0 : i64, scratch_operands = 4 : i64, tpu.core_type = #tpu.core_type<tc>, window_params = [{transform_indices = @transform_0, window_bounds = array<i64: 1, 1, 8, 128>}, {transform_indices = @transform_1, window_bounds = array<i64: 1, 1, 8, 128>}, {transform_indices = @transform_2, window_bounds = array<i64: 1, 1, 1, 1>}, {transform_indices = @transform_3, window_bounds = array<i64: 1, 1, 1, 1>}]} {
    %c0_i32 = arith.constant 0 : i32
    %0 = arith.cmpi eq, %arg2, %c0_i32 : i32
    %1 = arith.extui %0 : i1 to i32
    %c0_i32_0 = arith.constant 0 : i32
    %2 = arith.cmpi ne, %1, %c0_i32_0 : i32
    scf.if %2 {
      %cst_34 = arith.constant 0.000000e+00 : f32
      %50 = vector.broadcast %cst_34 : f32 to vector<8x128xf32>
      %c0_35 = arith.constant 0 : index
      %c0_36 = arith.constant 0 : index
      %51 = vector.load %arg7[%c0_35, %c0_36] : memref<8x128xf32, #tpu.memory_space<vmem>>, vector<8x128xf32>
      tpu.vector_store %arg7[%c0_35, %c0_36], %50 {strides = array<i32>} : memref<8x128xf32, #tpu.memory_space<vmem>>, vector<8x128xf32>,
      %cst_37 = arith.constant 0.000000e+00 : f32
      %52 = vector.broadcast %cst_37 : f32 to vector<8x128xf32>
      %c0_38 = arith.constant 0 : index
      %c0_39 = arith.constant 0 : index
      %53 = vector.load %arg8[%c0_38, %c0_39] : memref<8x128xf32, #tpu.memory_space<vmem>>, vector<8x128xf32>
      tpu.vector_store %arg8[%c0_38, %c0_39], %52 {strides = array<i32>} : memref<8x128xf32, #tpu.memory_space<vmem>>, vector<8x128xf32>,
      %cst_40 = arith.constant 0.000000e+00 : f32
      %54 = vector.broadcast %cst_40 : f32 to vector<8x128xf32>
      %c0_41 = arith.constant 0 : index
      %c0_42 = arith.constant 0 : index
      %55 = vector.load %arg9[%c0_41, %c0_42] : memref<8x128xf32, #tpu.memory_space<vmem>>, vector<8x128xf32>
      tpu.vector_store %arg9[%c0_41, %c0_42], %54 {strides = array<i32>} : memref<8x128xf32, #tpu.memory_space<vmem>>, vector<8x128xf32>,
      %cst_43 = arith.constant 0.000000e+00 : f32
      %56 = vector.broadcast %cst_43 : f32 to vector<8x128xf32>
      %c0_44 = arith.constant 0 : index
      %c0_45 = arith.constant 0 : index
      %57 = vector.load %arg10[%c0_44, %c0_45] : memref<8x128xf32, #tpu.memory_space<vmem>>, vector<8x128xf32>
      tpu.vector_store %arg10[%c0_44, %c0_45], %56 {strides = array<i32>} : memref<8x128xf32, #tpu.memory_space<vmem>>, vector<8x128xf32>,
    } else {
    }
    %c0 = arith.constant 0 : index
    %c0_1 = arith.constant 0 : index
    %c0_2 = arith.constant 0 : index
    %c0_3 = arith.constant 0 : index
    %3 = vector.load %arg3[%c0, %c0_1, %c0_2, %c0_3] : memref<1x1x8x128xf32, #tpu.memory_space<vmem>>, vector<1x1x8x128xf32>
    %4 = vector.shape_cast %3 : vector<1x1x8x128xf32> to vector<8x128xf32>
    %c0_4 = arith.constant 0 : index
    %c0_5 = arith.constant 0 : index
    %c0_6 = arith.constant 0 : index
    %c0_7 = arith.constant 0 : index
    %5 = vector.load %arg4[%c0_4, %c0_5, %c0_6, %c0_7] : memref<1x1x8x128xbf16, #tpu.memory_space<vmem>>, vector<1x1x8x128xbf16>
    %6 = vector.shape_cast %5 : vector<1x1x8x128xbf16> to vector<8x128xbf16>
    %7 = arith.extf %6 : vector<8x128xbf16> to vector<8x128xf32>
    %8 = math.absf %4 : vector<8x128xf32>
    %cst = arith.constant 0.000000e+00 : f32
    %9 = vector.broadcast %cst : f32 to vector<8x128xf32>
    %10 = arith.subf %9, %8 : vector<8x128xf32>
    %11 = math.exp %10 : vector<8x128xf32>
    %12 = math.log1p %11 : vector<8x128xf32>
    %cst_8 = arith.constant 0.000000e+00 : f32
    %13 = vector.broadcast %cst_8 : f32 to vector<8x128xf32>
    %14 = arith.maximumf %4, %13 : vector<8x128xf32>
    %15 = arith.mulf %4, %7 : vector<8x128xf32>
    %16 = arith.subf %14, %15 : vector<8x128xf32>
    %17 = arith.addf %16, %12 : vector<8x128xf32>
    %cst_9 = arith.constant 1.000000e+00 : f32
    %18 = vector.broadcast %cst_9 : f32 to vector<8x128xf32>
    %19 = arith.addf %18, %11 : vector<8x128xf32>
    %cst_10 = arith.constant 1.000000e+00 : f32
    %20 = vector.broadcast %cst_10 : f32 to vector<8x128xf32>
    %21 = arith.divf %20, %19 : vector<8x128xf32>
    %cst_11 = arith.constant 0.000000e+00 : f32
    %22 = vector.broadcast %cst_11 : f32 to vector<8x128xf32>
    %23 = arith.cmpf oge, %4, %22 : vector<8x128xf32>
    %24 = arith.mulf %11, %21 : vector<8x128xf32>
    %25 = arith.select %23, %21, %24 : vector<8x128xi1>, vector<8x128xf32>
    %c0_12 = arith.constant 0 : index
    %c0_13 = arith.constant 0 : index
    %26 = vector.load %arg7[%c0_12, %c0_13] : memref<8x128xf32, #tpu.memory_space<vmem>>, vector<8x128xf32>
    %27 = vector.shape_cast %17 : vector<8x128xf32> to vector<1x8x128xf32>
    %cst_14 = arith.constant dense<0.000000e+00> : vector<8x128xf32>
    %28 = vector.multi_reduction <add>, %27, %cst_14 [0] : vector<1x8x128xf32> to vector<8x128xf32>
    %29 = arith.addf %26, %28 : vector<8x128xf32>
    %c0_15 = arith.constant 0 : index
    %c0_16 = arith.constant 0 : index
    %30 = vector.load %arg7[%c0_15, %c0_16] : memref<8x128xf32, #tpu.memory_space<vmem>>, vector<8x128xf32>
    tpu.vector_store %arg7[%c0_15, %c0_16], %29 {strides = array<i32>} : memref<8x128xf32, #tpu.memory_space<vmem>>, vector<8x128xf32>,
    %c0_17 = arith.constant 0 : index
    %c0_18 = arith.constant 0 : index
    %31 = vector.load %arg8[%c0_17, %c0_18] : memref<8x128xf32, #tpu.memory_space<vmem>>, vector<8x128xf32>
    %32 = arith.mulf %25, %7 : vector<8x128xf32>
    %33 = vector.shape_cast %32 : vector<8x128xf32> to vector<1x8x128xf32>
    %cst_19 = arith.constant dense<0.000000e+00> : vector<8x128xf32>
    %34 = vector.multi_reduction <add>, %33, %cst_19 [0] : vector<1x8x128xf32> to vector<8x128xf32>
    %35 = arith.addf %31, %34 : vector<8x128xf32>
    %c0_20 = arith.constant 0 : index
    %c0_21 = arith.constant 0 : index
    %36 = vector.load %arg8[%c0_20, %c0_21] : memref<8x128xf32, #tpu.memory_space<vmem>>, vector<8x128xf32>
    tpu.vector_store %arg8[%c0_20, %c0_21], %35 {strides = array<i32>} : memref<8x128xf32, #tpu.memory_space<vmem>>, vector<8x128xf32>,
    %c0_22 = arith.constant 0 : index
    %c0_23 = arith.constant 0 : index
    %37 = vector.load %arg9[%c0_22, %c0_23] : memref<8x128xf32, #tpu.memory_space<vmem>>, vector<8x128xf32>
    %38 = vector.shape_cast %25 : vector<8x128xf32> to vector<1x8x128xf32>
    %cst_24 = arith.constant dense<0.000000e+00> : vector<8x128xf32>
    %39 = vector.multi_reduction <add>, %38, %cst_24 [0] : vector<1x8x128xf32> to vector<8x128xf32>
    %40 = arith.addf %37, %39 : vector<8x128xf32>
    %c0_25 = arith.constant 0 : index
    %c0_26 = arith.constant 0 : index
    %41 = vector.load %arg9[%c0_25, %c0_26] : memref<8x128xf32, #tpu.memory_space<vmem>>, vector<8x128xf32>
    tpu.vector_store %arg9[%c0_25, %c0_26], %40 {strides = array<i32>} : memref<8x128xf32, #tpu.memory_space<vmem>>, vector<8x128xf32>,
    %c0_27 = arith.constant 0 : index
    %c0_28 = arith.constant 0 : index
    %42 = vector.load %arg10[%c0_27, %c0_28] : memref<8x128xf32, #tpu.memory_space<vmem>>, vector<8x128xf32>
    %43 = vector.shape_cast %7 : vector<8x128xf32> to vector<1x8x128xf32>
    %cst_29 = arith.constant dense<0.000000e+00> : vector<8x128xf32>
    %44 = vector.multi_reduction <add>, %43, %cst_29 [0] : vector<1x8x128xf32> to vector<8x128xf32>
    %45 = arith.addf %42, %44 : vector<8x128xf32>
    %c0_30 = arith.constant 0 : index
    %c0_31 = arith.constant 0 : index
    %46 = vector.load %arg10[%c0_30, %c0_31] : memref<8x128xf32, #tpu.memory_space<vmem>>, vector<8x128xf32>
    tpu.vector_store %arg10[%c0_30, %c0_31], %45 {strides = array<i32>} : memref<8x128xf32, #tpu.memory_space<vmem>>, vector<8x128xf32>,
    %c0_i32_32 = arith.constant 0 : i32
    %47 = arith.cmpi eq, %arg2, %c0_i32_32 : i32
    %48 = arith.extui %47 : i1 to i32
    %c0_i32_33 = arith.constant 0 : i32
    %49 = arith.cmpi ne, %48, %c0_i32_33 : i32
    scf.if %49 {
      %c0_34 = arith.constant 0 : index
      %c0_35 = arith.constant 0 : index
      %50 = vector.load %arg7[%c0_34, %c0_35] : memref<8x128xf32, #tpu.memory_space<vmem>>, vector<8x128xf32>
      %51 = vector.shape_cast %50 : vector<8x128xf32> to vector<1x8x128xf32>
      %cst_36 = arith.constant dense<0.000000e+00> : vector<1xf32>
      %52 = vector.multi_reduction <add>, %51, %cst_36 [1, 2] : vector<1x8x128xf32> to vector<1xf32>
      %53 = vector.shape_cast %52 : vector<1xf32> to vector<1x1x1xf32>
      %54 = vector.extract %53[0, 0, 0] : f32 from vector<1x1x1xf32>
      %55 = vector.broadcast %54 : f32 to vector<1x1xf32>
      %cst_37 = arith.constant 9.765625E-4 : f32
      %56 = vector.broadcast %cst_37 : f32 to vector<1x1xf32>
      %57 = arith.mulf %55, %56 : vector<1x1xf32>
      %c0_38 = arith.constant 0 : index
      %c0_39 = arith.constant 0 : index
      %c0_40 = arith.constant 0 : index
      %c0_41 = arith.constant 0 : index
      %58 = vector.load %arg5[%c0_38, %c0_39, %c0_40, %c0_41] : memref<1x1x1x1xf32, #tpu.memory_space<vmem>>, vector<1x1x1x1xf32>
      %59 = vector.shape_cast %58 : vector<1x1x1x1xf32> to vector<1x1xf32>
      %60 = vector.shape_cast %57 : vector<1x1xf32> to vector<1x1x1x1xf32>
      tpu.vector_store %arg5[%c0_38, %c0_39, %c0_40, %c0_41], %60 {strides = array<i32>} : memref<1x1x1x1xf32, #tpu.memory_space<vmem>>, vector<1x1x1x1xf32>,
      %c0_42 = arith.constant 0 : index
      %c0_43 = arith.constant 0 : index
      %61 = vector.load %arg8[%c0_42, %c0_43] : memref<8x128xf32, #tpu.memory_space<vmem>>, vector<8x128xf32>
      %62 = vector.shape_cast %61 : vector<8x128xf32> to vector<1x8x128xf32>
      %cst_44 = arith.constant dense<0.000000e+00> : vector<1xf32>
      %63 = vector.multi_reduction <add>, %62, %cst_44 [1, 2] : vector<1x8x128xf32> to vector<1xf32>
      %64 = vector.shape_cast %63 : vector<1xf32> to vector<1x1x1xf32>
      %65 = vector.extract %64[0, 0, 0] : f32 from vector<1x1x1xf32>
      %66 = vector.broadcast %65 : f32 to vector<1x1xf32>
      %c0_45 = arith.constant 0 : index
      %c0_46 = arith.constant 0 : index
      %67 = vector.load %arg9[%c0_45, %c0_46] : memref<8x128xf32, #tpu.memory_space<vmem>>, vector<8x128xf32>
      %68 = vector.shape_cast %67 : vector<8x128xf32> to vector<1x8x128xf32>
      %cst_47 = arith.constant dense<0.000000e+00> : vector<1xf32>
      %69 = vector.multi_reduction <add>, %68, %cst_47 [1, 2] : vector<1x8x128xf32> to vector<1xf32>
      %70 = vector.shape_cast %69 : vector<1xf32> to vector<1x1x1xf32>
      %71 = vector.extract %70[0, 0, 0] : f32 from vector<1x1x1xf32>
      %72 = vector.broadcast %71 : f32 to vector<1x1xf32>
      %c0_48 = arith.constant 0 : index
      %c0_49 = arith.constant 0 : index
      %73 = vector.load %arg10[%c0_48, %c0_49] : memref<8x128xf32, #tpu.memory_space<vmem>>, vector<8x128xf32>
      %74 = vector.shape_cast %73 : vector<8x128xf32> to vector<1x8x128xf32>
      %cst_50 = arith.constant dense<0.000000e+00> : vector<1xf32>
      %75 = vector.multi_reduction <add>, %74, %cst_50 [1, 2] : vector<1x8x128xf32> to vector<1xf32>
      %76 = vector.shape_cast %75 : vector<1xf32> to vector<1x1x1xf32>
      %77 = vector.extract %76[0, 0, 0] : f32 from vector<1x1x1xf32>
      %78 = vector.broadcast %77 : f32 to vector<1x1xf32>
      %79 = arith.addf %72, %78 : vector<1x1xf32>
      %cst_51 = arith.constant 2.000000e+00 : f32
      %80 = vector.broadcast %cst_51 : f32 to vector<1x1xf32>
      %81 = arith.mulf %80, %66 : vector<1x1xf32>
      %cst_52 = arith.constant 1.000000e+00 : f32
      %82 = vector.broadcast %cst_52 : f32 to vector<1x1xf32>
      %83 = arith.addf %81, %82 : vector<1x1xf32>
      %cst_53 = arith.constant 1.000000e+00 : f32
      %84 = vector.broadcast %cst_53 : f32 to vector<1x1xf32>
      %85 = arith.addf %79, %84 : vector<1x1xf32>
      %86 = arith.divf %83, %85 : vector<1x1xf32>
      %cst_54 = arith.constant 1.000000e+00 : f32
      %87 = vector.broadcast %cst_54 : f32 to vector<1x1xf32>
      %88 = arith.subf %87, %86 : vector<1x1xf32>
      %c0_55 = arith.constant 0 : index
      %c0_56 = arith.constant 0 : index
      %c0_57 = arith.constant 0 : index
      %c0_58 = arith.constant 0 : index
      %89 = vector.load %arg6[%c0_55, %c0_56, %c0_57, %c0_58] : memref<1x1x1x1xf32, #tpu.memory_space<vmem>>, vector<1x1x1x1xf32>
      %90 = vector.shape_cast %89 : vector<1x1x1x1xf32> to vector<1x1xf32>
      %91 = vector.shape_cast %88 : vector<1x1xf32> to vector<1x1x1x1xf32>
      tpu.vector_store %arg6[%c0_55, %c0_56, %c0_57, %c0_58], %91 {strides = array<i32>} : memref<1x1x1x1xf32, #tpu.memory_space<vmem>>, vector<1x1x1x1xf32>,
    } else {
    }
    return
  }
  func.func @transform_0(%arg0: i32, %arg1: i32, %arg2: i32) -> (i32, i32, i32, i32) {
    %c1_i32 = arith.constant 1 : i32
    %0 = arith.addi %arg1, %c1_i32 : i32
    %c0_i32 = arith.constant 0 : i32
    %c0_i32_0 = arith.constant 0 : i32
    return %arg0, %0, %arg2, %c0_i32 : i32, i32, i32, i32
  }
  func.func @transform_1(%arg0: i32, %arg1: i32, %arg2: i32) -> (i32, i32, i32, i32) {
    %c1_i32 = arith.constant 1 : i32
    %0 = arith.addi %arg1, %c1_i32 : i32
    %c0_i32 = arith.constant 0 : i32
    %c0_i32_0 = arith.constant 0 : i32
    return %arg0, %0, %arg2, %c0_i32 : i32, i32, i32, i32
  }
  func.func @transform_2(%arg0: i32, %arg1: i32, %arg2: i32) -> (i32, i32, i32, i32) {
    %c0_i32 = arith.constant 0 : i32
    %c0_i32_0 = arith.constant 0 : i32
    %c0_i32_1 = arith.constant 0 : i32
    return %arg0, %arg1, %c0_i32, %c0_i32_0 : i32, i32, i32, i32
  }
  func.func @transform_3(%arg0: i32, %arg1: i32, %arg2: i32) -> (i32, i32, i32, i32) {
    %c0_i32 = arith.constant 0 : i32
    %c0_i32_0 = arith.constant 0 : i32
    %c0_i32_1 = arith.constant 0 : i32
    return %arg0, %arg1, %c0_i32, %c0_i32_0 : i32, i32, i32, i32
  }
}

</mosaic_0001>

<bundles_post_ra>
// kernel: tpu_custom_call.1
= control target key start
LH: loop header
LB: loop body
LE: loop exit
PB: predicated region body
PF: predicated region fallthrough
CT: control target
= control target key end

     0   :  { %9 = vsyncpa [#allocation7], 0  ;;  %s1023_s0 = inlined_call_operand.hbm [shape: f32[2,4,8,128], index: 0, kind: input, shape index: {}]   ;;  %s1024_s1 = inlined_call_operand.hbm [shape: bf16[2,4,8,128], index: 1, kind: input, shape index: {}]   ;;  %s1025_s2 = inlined_call_operand.vmem [shape: f32[2,3,1,1], index: 2, kind: output, shape index: {0}]   ;;  %s1026_s3 = inlined_call_operand.vmem [shape: f32[2,3,1,1], index: 3, kind: output, shape index: {1}]  }
   0x1   :  { %11 = vsyncpa [#allocation7 + $0x1], 0 }
   0x2   :  { %12 = vsyncpa [#allocation9], 0 }
   0x3   :  { %14 = vsyncpa [#allocation9 + $0x1], 0  ;;  %s825_s12 = smov 0   ;;  %s827_s13 = smov 0  }
   0x4   :  { %s829_s14 = smov 0   ;;  %s831_s15 = smov 0  }
   0x5   :  { %s833_s16 = smov 0   ;;  %s835_s17 = smov 0  }
   0x6   :  { %s837_s18 = smov 0   ;;  %s839_s19 = smov 0  }
   0x7 LB: > { %s561_s20 = sadd.s32 4294967295, %s801_s19   ;;  %s35_s21 = sadd.s32 1, %s793_s17  ;;  %s801_s19 = sphi %s839_s19, %s20_s19   ;;  %s797_s18 = sphi %s837_s18, %s1042_s18   ;;  %s793_s17 = sphi %s835_s17, %s1041_s17   ;;  %s789_s16 = sphi %s833_s16, %s1040_s16   ;;  %s785_s15 = sphi %s831_s15, %s1039_s15   ;;  %s781_s14 = sphi %s829_s14, %s1038_s14   ;;  %s777_s13 = sphi %s827_s13, %s1037_s13   ;;  %s773_s12 = sphi %s825_s12, %s1036_s12  }
   0x8   : > { %p37_p0 = scmp.ge.s32.totalorder %s35_s21, 3  ;;  %s39_s22 = sadd.s32 1, %s797_s18 }
   0x9   : > { %s52_s23 = sadd.s32 1, %s781_s14  ;;  %p59_p1 = scmp.ne.s32.totalorder %s781_s14, %s777_s13 }
   0xa   : > { %s869_s24 = scalar_select %p37_p0, 0, %s35_s21  }
   0xb   : > { %s1044_s22 = smov (!%p37_p0, %s39_s22), %s797_s18  ;;  %p60_p2 = scmp.eq.s32.totalorder %s801_s19, 0 }
   0xc   : > { %s44_s25 = sadd.s32 1, %s869_s24  ;;  %p41_p3 = scmp.ge.s32.totalorder %s1044_s22, 2 }
   0xd   : > { %s46_s26 = ssub.s32 %s35_s21, %s44_s25  ;;  %p874_p4 = por %p60_p2, %p59_p1 }
   0xe   : > { %p65_p5 = scmp.ne.s32.totalorder %s777_s13, %s773_s12  ;;  %s1046_s22 = smov (%p41_p3, %s1044_s22), 0 }
   0xf   : > { %p66_p6 = scmp.eq.s32.totalorder %s561_s20, 0  ;;  %s45_s28 = ssub.s32 %s797_s18, %s1046_s22 }
  0x10   : > { %p596_p7 = scmp.lt.s32.totalorder %s801_s19, 6  ;;  %s47_s29 = sor.u32 %s46_s26, %s45_s28 }
  0x11   : > { %p884_p8 = por %p66_p6, %p65_p5  ;;  %p50_p9 = scmp.eq.s32.totalorder %s47_s29, 0 }
  0x12   : > { %s889_s4 = sand.u32 1, %s781_s14   ;;  %s566_s7 = sshll.u32 %s797_s18, 2 }
  0x13   : > { %s1029_s30 = scalar_select %p884_p8, 1, 0 }
  0x14   : > { %s565_s5 = sshll.u32 %s889_s4, 3  ;;  %s897_s8 = sadd.s32 %s793_s17, %s566_s7 }
  0x15   : > { %s893_s6 = scalar_select %p50_p9, %s781_s14, %s52_s23  }
  0x16   : > { %s181_s9 = scalar_lea.vmem [#allocation6], %s565_s5  ;;  %s567_s11 = sshll.u32 %s897_s8, 7 }
  0x17   : > { %s192_s10 = sshll.u32 %s181_s9, 4  ;;  %s458_s21 = scalar_lea.hbm %s1023_s0, %s567_s11  ;;  %s900_s10 = int_to_ptr.vmem [resolvable:$true] %s192_s10 }
  0x18   : > { %p909_p10 = pnand %p596_p7, %p874_p4  ;;  %s913_s23 = scalar_lea.hbm %s458_s21, 128 }
  0x19   : > { %s178_s26 = scalar_lea.sflag [#allocation7], %s889_s4  ;;  %s699_s28 = scalar_lea.hbm %s458_s21, 256 }
  0x1a   : > { %p670_p13 = scmp.ne.s32.totalorder %s913_s23, %s699_s28  ;;  %p671_p0 = pneg %p909_p10 }
  0x1b   : > { %s674_s5 = scalar_lea.hbm %s1023_s0, 1024  ;;  %p675_p3 = scmp.lt.u32.totalorder %s913_s23, %s1023_s0 }
  0x1c   : > { %p672_p1 = pnand %p671_p0, %p670_p13  ;;  %p676_p4 = scmp.lt.u32.totalorder %s674_s5, %s699_s28 }
  0x1d   : > { %p678_p6 = scmp.lt.u32.totalorder %s699_s28, %s913_s23 }
  0x1e   : > { %p673_p2 = pneg %p672_p1  ;;  %p677_p5 = por %p676_p4, %p675_p3 }
  0x20   : > { %p679_p7 = por %p678_p6, %p677_p5 }
  0x22   : > { %p680_p9 = pnand %p679_p7, %p673_p2 }
  0x24   : > { %683 = shalt.err (!%p680_p9)
}
  0x25   : > { %s684_s11 = scalar_lea.vmem %s900_s10, 128  ;;  %s803_s12 = smov [#allocation6]  }
  0x26   : > { %p685_p13 = scmp.ne.s32.totalorder %s900_s10, %s684_s11  ;;  %s689_s20 = sshll.u32 %s803_s12, 4  ;;  %s690_s20 = int_to_ptr.vmem [resolvable:$false] %s689_s20 }
  0x27   : > { %s691_s21 = scalar_lea.vmem %s690_s20, 256  ;;  %p692_p12 = scmp.lt.s32.totalorder %s900_s10, %s690_s20 }
  0x28   : > { %p687_p1 = pnand %p685_p13, %p671_p0  ;;  %p693_p3 = scmp.lt.s32.totalorder %s691_s21, %s684_s11 }
  0x2a   : > { %p688_p11 = pneg %p687_p1  ;;  %p694_p4 = por %p693_p3, %p692_p12 }
  0x2c   : > { %p695_p5 = pnand %p694_p4, %p688_p11 }
  0x2e   : > { %698 = shalt.err (!%p695_p5)
}
  0x2f   : > { %592 = dma.hbm_to_vmem [thread:$0]  (!%p909_p10), %s913_s23, 128, %s900_s10, %s178_s26  }
  0x30   : > { %p1031_p2 = scmp.lt.s32.totalorder %s801_s19, 7  ;;  %p1032_p6 = scmp.ge.s32.totalorder %s801_s19, 1 }
  0x31   : > { %s568_s27 = sshll.u32 %s889_s4, 2  ;;  %s570_s29 = sshll.u32 %s897_s8, 6 }
  0x32   : > { %p946_p7 = pnand %p1032_p6, %p1031_p2  ;;  %s467_s9 = scalar_lea.hbm %s1024_s1, %s570_s29 }
  0x33   : > { %s955_s11 = scalar_lea.hbm %s467_s9, 64  ;;  %s203_s12 = scalar_lea.vmem [#allocation8], %s568_s27 }
  0x34   : > { %s1033_s28 = scalar_select %p946_p7, 1, 0 }
  0x35   : > { %s214_s20 = sshll.u32 %s203_s12, 4  ;;  %s200_s10 = scalar_lea.sflag [#allocation9], %s889_s4  ;;  %s215_s20 = int_to_ptr.vmem [resolvable:$true] %s214_s20 }
  0x36   : > { %s730_s23 = scalar_lea.hbm %s467_s9, 128  ;;  %s705_s21 = scalar_lea.hbm %s1024_s1, 512 }
  0x37   : > { %p701_p11 = scmp.ne.s32.totalorder %s955_s11, %s730_s23  ;;  %p706_p13 = scmp.lt.u32.totalorder %s955_s11, %s1024_s1 }
  0x38   : > { %p707_p1 = scmp.lt.u32.totalorder %s705_s21, %s730_s23  ;;  %p709_p4 = scmp.lt.u32.totalorder %s730_s23, %s955_s11 }
  0x39   : > { %p703_p12 = pnand %p701_p11, %p671_p0 }
  0x3a   : > { %p708_p3 = por %p707_p1, %p706_p13 }
  0x3b   : > { %p704_p9 = pneg %p703_p12 }
  0x3c   : > { %p710_p5 = por %p709_p4, %p708_p3 }
  0x3e   : > { %p711_p2 = pnand %p710_p5, %p704_p9 }
  0x40   : > { %714 = shalt.err (!%p711_p2)
}
  0x41   : > { %s715_s4 = scalar_lea.vmem %s215_s20, 64  ;;  %s804_s27 = smov [#allocation8]  }
  0x42   : > { %p716_p6 = scmp.ne.s32.totalorder %s215_s20, %s715_s4  ;;  %s720_s7 = sshll.u32 %s804_s27, 4  ;;  %s721_s7 = int_to_ptr.vmem [resolvable:$false] %s720_s7 }
  0x43   : > { %s722_s9 = scalar_lea.vmem %s721_s7, 128  ;;  %p723_p8 = scmp.lt.s32.totalorder %s215_s20, %s721_s7 }
  0x44   : > { %p718_p11 = pnand %p716_p6, %p671_p0  ;;  %p724_p7 = scmp.lt.s32.totalorder %s722_s9, %s715_s4 }
  0x46   : > { %p719_p12 = pneg %p718_p11  ;;  %p725_p1 = por %p724_p7, %p723_p8 }
  0x48   : > { %p726_p13 = pnand %p725_p1, %p719_p12 }
  0x4a   : > { %729 = shalt.err (!%p726_p13)
}
  0x4b   : > { %595 = dma.hbm_to_vmem [thread:$0]  (!%p909_p10), %s955_s11, 64, %s215_s20, %s200_s10  }
  0x4c   : > { %p1034_p9 = scmp.ne.s32.totalorder %s1033_s28, 0 }
  0x4d   : > { %s225_s12 = sand.u32 (!%p1034_p9), 1, %s777_s13   ;;  %p1035_p0 = scmp.ne.s32.totalorder (!%p1034_p9), %s1029_s30, 0 }
  0x4e   : > { %223 = sbr.rel (%p1034_p9) target bundleno = 357 (0x165), region = 28  ;;  %s572_s23 = sshll.u32 (!%p1034_p9), %s225_s12, 3 }
  0x4f   : > { %s226_s8 = scalar_lea.sflag (!%p1034_p9), [#allocation7], %s225_s12  ;;  %s229_s26 = scalar_lea.vmem (!%p1034_p9), [#allocation6], %s572_s23 }
  0x55   : > { %764 = dma.done.wait (%p1035_p0), %s226_s8, 128  }
  0x56   : > { %766 = vsyncadd (%p1035_p0), %s226_s8, 4294967168  ;;  %s573_s21 = sshll.u32 %s225_s12, 2  ;;  %s235_s29 = scalar_lea.sflag [#allocation9], %s225_s12 }
  0x57   : > { %s238_s25 = scalar_lea.vmem [#allocation8], %s573_s21 }
  0x58   : > { %768 = dma.done.wait (%p1035_p0), %s235_s29, 64  }
  0x59   : > { %770 = vsyncadd (%p1035_p0), %s235_s29, 4294967232  ;;  %v299_v0 = vld [vmem:[%s229_s26] sm:$0xff]  ;;  %v300_v6 = vld [vmem:[%s238_s25] sm:$0xf]  ;;  %p277_p8 = scmp.lt.s32.totalorder %s789_s16, 1  ;;  %p279_p10 = scmp.lt.s32.totalorder %s785_s15, 2 }
  0x5a   : > { %v302_v1 = vand.u32 2147483647, %v299_v0  ;;  %v301_v8 = vunpack.c.l.bf16 %v300_v6  ;;  %v315_v11 = vmax.f32 %v299_v0, 0.0  ;;  %vm322_vm0 = vcmp.ge.f32.partialorder %v299_v0, 0.0 }
  0x5b   : > { %s1048_s16 = smov (!%p277_p8, %s789_s16), 1  ;;  %s1050_s15 = smov (!%p279_p10, %s785_s15), 2  ;;  %vm357_vm2 = vcmask 0  }
  0x5c   : > { %v303_v2 = vsub.f32 0.0, %v302_v1  ;;  %v316_v12 = vmul.f32 %v301_v8, %v299_v0  ;;  %s576_s30 = smul.u32 3, %s1048_s16 }
  0x5e   : > { %v304_v3 = vmul.f32 1.442695, %v303_v2  ;;  %v317_v17 = vsub.f32 %v315_v11, %v316_v12  ;;  %s282_s28 = sadd.s32 %s576_s30, %s1050_s15 }
  0x5f   : > { %s283_s5 = scalar_lea.vmem %s1025_s2, %s282_s28  ;;  %s290_s9 = scalar_lea.vmem %s1026_s3, %s282_s28 }
  0x60   : > { %661 = vpow2.f32 %v304_v3 }
  0x6a   : > { %v662_v4 = vpop.eup %661 }
  0x6b   : > { %v306_v5 = vadd.f32 1.0, %v662_v4  ;;  %v309_v7 = vmul.f32 -0.5, %v662_v4  ;;  %v312_v10 = vand.u32 2147483647, %v662_v4 }
  0x6d   : > { %663 = vrcp.f32 %v306_v5  ;;  %v310_v9 = vadd.f32 1.0, %v309_v7  ;;  %vm313_vm1 = vcmp.lt.f32.partialorder %v312_v10, 0.0004427343 }
  0x6e   : > { %665 = vlog2.f32 %v306_v5 }
  0x6f   : > { %v311_v14 = vmul.f32 %v662_v4, %v310_v9 }
  0x77   : > { %v664_v13 = vpop.eup %663 }
  0x78   : > { %v666_v15 = vpop.eup %665  ;;  %v323_v16 = vmul.f32 %v664_v13, %v662_v4 }
  0x79   : > { %v308_v18 = vmul.f32 0.6931472, %v666_v15 }
  0x7a   : > { %v324_v19 = vsel %vm322_vm0, %v664_v13, %v323_v16 }
  0x7b   : > { %371 = vadd.xlane.f32.xlu1 %v324_v19  ;;  %v314_v20 = vsel %vm313_vm1, %v311_v14, %v308_v18  ;;  %v330_v22 = vmul.f32 %v324_v19, %v301_v8 }
  0x7c   : > { %v318_v21 = vadd.f32 %v317_v17, %v314_v20 }
  0x7e   : > { %346 = vadd.xlane.f32.xlu0 %v318_v21 }
  0x7f   : > { %382 = vadd.xlane.f32.xlu1 %v301_v8 }
  0x82   : > { %360 = vadd.xlane.f32.xlu0 %v330_v22 }
 0x108   : > { %v372_v23 = vpop.xlane.xlu1 %371 }
 0x109   : > { %v373_v24 = vrot.slane %v372_v23, 4 }
 0x10b   : > { %v374_v25 = vadd.f32 %v373_v24, %v372_v23  ;;  %v347_v26 = vpop.xlane.xlu0 %346 }
 0x10c   : > { %v348_v27 = vrot.slane %v347_v26, 4  ;;  %v383_v28 = vpop.xlane.xlu1 %382 }
 0x10d   : > { %v384_v29 = vrot.slane %v383_v28, 4  ;;  %v375_v31 = vrot.slane %v374_v25, 2 }
 0x10e   : > { %v349_v30 = vadd.f32 %v348_v27, %v347_v26 }
 0x10f   : > { %v385_v32 = vadd.f32 %v384_v29, %v383_v28  ;;  %v361_v33 = vpop.xlane.xlu0 %360  ;;  %v376_v39 = vadd.f32 %v375_v31, %v374_v25 }
 0x110   : > { %v350_v34 = vrot.slane %v349_v30, 2  ;;  %v362_v35 = vrot.slane %v361_v33, 4 }
 0x111   : > { %v386_v36 = vrot.slane %v385_v32, 2  ;;  %v377_v45 = vrot.slane %v376_v39, 1 }
 0x112   : > { %v363_v37 = vadd.f32 %v362_v35, %v361_v33  ;;  %v351_v38 = vadd.f32 %v350_v34, %v349_v30 }
 0x113   : > { %v387_v40 = vadd.f32 %v386_v36, %v385_v32  ;;  %v378_v49 = vadd.f32 %v377_v45, %v376_v39 }
 0x114   : > { %v364_v41 = vrot.slane %v363_v37, 2  ;;  %v352_v42 = vrot.slane %v351_v38, 1 }
 0x115   : > { %v388_v47 = vrot.slane %v387_v40, 1 }
 0x116   : > { %v365_v43 = vadd.f32 %v364_v41, %v363_v37  ;;  %v353_v44 = vadd.f32 %v352_v42, %v351_v38 }
 0x117   : > { %v389_v50 = vadd.f32 %v388_v47, %v387_v40 }
 0x118   : > { %577 = vpush %v353_v44  ;;  %v366_v46 = vrot.slane %v365_v43, 1 }
 0x11a   : > { %v367_v48 = vadd.f32 %v366_v46, %v365_v43 }
 0x11c   : > { %579 = vpush %v367_v48 }
 0x11d   : > { %581 = vpush %v378_v49 }
 0x11e   : > { %583 = vpush %v389_v50 }
 0x149   : > { %s578_s11 = spop %577 }
 0x14a   : > { %v355_v51 = vstv %s578_s11 }
 0x14b   : > { %v356_v52 = vmul.f32 0.0009765625, %v355_v51 }
 0x14d   : > { %358 = vst.msk [vmem:[%s283_s5] sm:$0x1] %vm357_vm2, %v356_v52  ;;  %s580_s4 = spop %579 }
 0x14e   : > { %s582_s27 = spop %581  ;;  %v369_v57 = vstv %s580_s4 }
 0x14f   : > { %v380_v53 = vstv %s582_s27  ;;  %s584_s7 = spop %583  ;;  %v393_v58 = vmul.f32 2.0, %v369_v57 }
 0x150   : > { %v391_v54 = vstv %s584_s7 }
 0x151   : > { %v392_v55 = vadd.f32 %v391_v54, %v380_v53  ;;  %v394_v59 = vadd.f32 1.0, %v393_v58 }
 0x153   : > { %v395_v56 = vadd.f32 1.0, %v392_v55 }
 0x155   : > { %667 = vrcp.f32 %v395_v56 }
 0x15f   : > { %v668_v60 = vpop.eup %667 }
 0x160   : > { %v397_v61 = vmul.f32 %v668_v60, %v394_v59 }
 0x162   : > { %v398_v62 = vsub.f32 1.0, %v397_v61 }
 0x164   : > { %399 = vst.msk [vmem:[%s290_s9] sm:$0x1] %vm357_vm2, %v398_v62 }
 0x165 PF: > { %s20_s19 = sadd.s32 1, %s801_s19   ;;  %s1036_s12 = smov %s777_s13 }
 0x166   : > { %p17_p7 = scmp.ge.s32.totalorder %s20_s19, 8   ;;  %s1037_s13 = smov %s781_s14 }
 0x167   : > { %s1038_s14 = smov %s893_s6  ;;  %s1039_s15 = smov %s793_s17 }
 0x168   : > { %s1040_s16 = smov %s797_s18  ;;  %s1041_s17 = smov %s869_s24 }
 0x169   : > { %s1042_s18 = smov %s1046_s22  ;;  %19 = sbr.rel (!%p17_p7) target bundleno = 7 (0x7), region = 101 }
 0x170   :  { %445 = vsyncpa [#allocation7], 1 }
 0x171   :  { %447 = vsyncpa [#allocation7 + $0x1], 1 }
 0x172   :  { %448 = vsyncpa [#allocation9], 1 }
 0x173   :  { %450 = vsyncpa [#allocation9 + $0x1], 1 }

</bundles_post_ra>
